<compile_context>
chip_gen: v7x
topology: tpu7x:2x2x1
jax: 0.10.0
libtpu: 0.0.40
codegen_flags: <defaults>
</compile_context>

<pallas_src>
import jax
import jax.numpy as jnp
from jax.experimental import pallas as pl
from jax.experimental.pallas import tpu as pltpu


def _patch_embed_kernel(x_ref, w_ref, addp_ref, cls_ref, o_ref):
    # x_ref:    (g * n_patches, K)   patch rows of `g` whole images
    # w_ref:    (K, D)               conv weight reshaped to a matmul
    # addp_ref: (n_patches, D)       conv bias + positional rows 1..n_patches
    # cls_ref:  (1, D)               cls token + positional row 0
    # o_ref:    (g, 1 + n_patches, D) final output slab for those g images
    g, s, d = o_ref.shape
    n_p = s - 1

    # MXU projection with f32 accumulation.
    y = jnp.dot(x_ref[...], w_ref[...], preferred_element_type=jnp.float32)
    # Re-split into per-image blocks so the positional rows line up per image
    # (pos must "wrap" per image once batch is folded into M).
    y = y.reshape(g, n_p, d) + addp_ref[...][None, :, :].astype(jnp.float32)

    # Fused cls row (row 0 of every image) + patch rows (1..n_patches).
    # Output block equals the full (1+n_patches, D) extent, so the 1-row offset
    # store on the sublane dim is legal.
    o_ref[:, 0:1, :] = jnp.broadcast_to(
        cls_ref[...][None, :, :], (g, 1, d)).astype(o_ref.dtype)
    o_ref[:, 1:, :] = y.astype(o_ref.dtype)


def patch_embed(x, conv_w, conv_b, cls_token, pos_embed, patch_size,
                *, target_m=256, use_bf16_operands=False):
    """x: (B, C, H, W) float32.  Returns (B, 1 + n_patches, D), matching
    nn.Conv2d(C, D, P, P) -> flatten -> transpose -> cat(cls) -> +pos_embed."""
    B, C, H, W = x.shape
    P = patch_size
    nh, nw = H // P, W // P
    n_patches = nh * nw
    D = conv_w.shape[0]
    K = C * P * P

    # --- glue: im2col patch extraction, (B, C, H, W) -> (B*n_patches, K) with
    # patch-vector ordering (c, ph, pw) so conv_w.reshape(D, K).T matches. ---
    patches = (
        x.reshape(B, C, nh, P, nw, P)
        .transpose(0, 2, 4, 1, 3, 5)
        .reshape(B * n_patches, K)
    )
    w_mat = conv_w.reshape(D, K).T                               # (K, D)

    # Tiny additive terms folded once in glue; added on the VPU in-kernel.
    add_patches = pos_embed[0, 1:, :] + conv_b[None, :]          # (n_patches, D)
    cls_row = (cls_token[0, 0, :] + pos_embed[0, 0, :])[None, :]  # (1, D)

    if use_bf16_operands:
        # Optional v6e/v7x fast path (bf16 MXU); accumulation stays f32.
        patches = patches.astype(jnp.bfloat16)
        w_mat = w_mat.astype(jnp.bfloat16)

    # --- fold batch into M: group `g` whole images per grid step so the MXU
    # tile is ~target_m rows; g must divide B so output slabs stay rectangular.
    g = min(B, max(1, target_m // n_patches))
    while g > 1 and B % g:
        g -= 1
    num_tiles = B // g
    tm = g * n_patches
    # TODO(synk): for very large K (ViT-L/H on v5e) add a K grid axis with an
    # f32 VMEM accumulator + pl.when init/finalize instead of one (K, D) block.

    out = pl.pallas_call(
        _patch_embed_kernel,
        out_shape=jax.ShapeDtypeStruct((B, 1 + n_patches, D), x.dtype),
        grid_spec=pltpu.PrefetchScalarGridSpec(
            num_scalar_prefetch=0,
            grid=(num_tiles,),
            in_specs=[
                pl.BlockSpec((tm, K), lambda t: (t, 0)),          # patch rows
                pl.BlockSpec((K, D), lambda t: (0, 0)),           # weight (resident)
                pl.BlockSpec((n_patches, D), lambda t: (0, 0)),   # bias + pos rows
                pl.BlockSpec((1, D), lambda t: (0, 0)),           # cls + pos[0]
            ],
            out_specs=pl.BlockSpec((g, 1 + n_patches, D), lambda t: (t, 0, 0)),
        ),
        compiler_params=pltpu.CompilerParams(
            dimension_semantics=("parallel",),
        ),
    )(patches, w_mat, add_patches, cls_row)
    return out


def _reference(x, conv_w, conv_b, cls_token, pos_embed, patch_size):
    """Pure-JAX reference using a real strided conv (matches nn.Conv2d)."""
    B = x.shape[0]
    D = conv_w.shape[0]
    y = jax.lax.conv_general_dilated(
        x, conv_w,
        window_strides=(patch_size, patch_size),
        padding="VALID",
        dimension_numbers=("NCHW", "OIHW", "NCHW"),
    ) + conv_b.reshape(1, D, 1, 1)
    y = y.reshape(B, D, -1).transpose(0, 2, 1)                   # (B, n_patches, D)
    cls = jnp.broadcast_to(cls_token, (B, 1, D))
    y = jnp.concatenate([cls, y], axis=1)
    return y + pos_embed


if __name__ == "__main__":
    # Small, module-consistent shapes: in_channels=4, image_size=32, patch_size=8,
    # embed_dim=128  ->  n_patches = (32//8)**2 = 16.
    B, C, IMG, P, D = 2, 4, 32, 8, 128
    n_patches = (IMG // P) ** 2

    key = jax.random.PRNGKey(0)
    kx, kw, kb, kc, kp = jax.random.split(key, 5)
    x = jax.random.normal(kx, (B, C, IMG, IMG), dtype=jnp.float32)
    conv_w = jax.random.normal(kw, (D, C, P, P), dtype=jnp.float32) * 0.02
    conv_b = jax.random.normal(kb, (D,), dtype=jnp.float32) * 0.02
    cls_token = jax.random.normal(kc, (1, 1, D), dtype=jnp.float32) * 0.02
    pos_embed = jax.random.normal(kp, (1, 1 + n_patches, D), dtype=jnp.float32) * 0.02

    out = patch_embed(x, conv_w, conv_b, cls_token, pos_embed, P)
    out = jax.block_until_ready(out)

    ref = _reference(x, conv_w, conv_b, cls_token, pos_embed, P)
    assert out.shape == (B, 1 + n_patches, D), out.shape
    err = float(jnp.max(jnp.abs(out - ref)))
    assert jnp.allclose(out, ref, atol=1e-4, rtol=1e-4), err

    print("KERNEL_OK")
</pallas_src>

<mosaic_0001>
module attributes {stable_mosaic.version = 11 : i64} {
  func.func @_patch_embed_kernel(%arg0: i32, %arg1: memref<32x256xf32, #tpu.memory_space<vmem>>, %arg2: memref<256x128xf32, #tpu.memory_space<vmem>>, %arg3: memref<16x128xf32, #tpu.memory_space<vmem>>, %arg4: memref<1x128xf32, #tpu.memory_space<vmem>>, %arg5: memref<2x17x128xf32, #tpu.memory_space<vmem>>) attributes {dimension_semantics = [#tpu.dimension_semantics<parallel>], iteration_bounds = array<i64: 1>, scalar_prefetch = 0 : i64, scratch_operands = 0 : i64, tpu.core_type = #tpu.core_type<tc>, window_params = [{transform_indices = @transform_0, window_bounds = array<i64: 32, 256>}, {pipeline_mode = #tpu.pipeline_mode<synchronous>, transform_indices = @transform_1, window_bounds = array<i64: 256, 128>}, {pipeline_mode = #tpu.pipeline_mode<synchronous>, transform_indices = @transform_2, window_bounds = array<i64: 16, 128>}, {pipeline_mode = #tpu.pipeline_mode<synchronous>, transform_indices = @transform_3, window_bounds = array<i64: 1, 128>}, {transform_indices = @transform_4, window_bounds = array<i64: 2, 17, 128>}]} {
    %c0 = arith.constant 0 : index
    %c0_0 = arith.constant 0 : index
    %0 = vector.load %arg1[%c0, %c0_0] : memref<32x256xf32, #tpu.memory_space<vmem>>, vector<32x256xf32>
    %c0_1 = arith.constant 0 : index
    %c0_2 = arith.constant 0 : index
    %1 = vector.load %arg2[%c0_1, %c0_2] : memref<256x128xf32, #tpu.memory_space<vmem>>, vector<256x128xf32>
    %cst = arith.constant dense<0.000000e+00> : vector<32x128xf32>
    %2 = tpu.matmul %0, %1, %cst {dimension_numbers = #tpu.dot_dimension_numbers<[1], [0], [0], [1], [0, 0, 1, 1], [], []>} : vector<32x256xf32>, vector<256x128xf32>, vector<32x128xf32> -> vector<32x128xf32>
    %3 = vector.shape_cast %2 : vector<32x128xf32> to vector<2x16x128xf32>
    %c0_3 = arith.constant 0 : index
    %c0_4 = arith.constant 0 : index
    %4 = vector.load %arg3[%c0_3, %c0_4] : memref<16x128xf32, #tpu.memory_space<vmem>>, vector<16x128xf32>
    %5 = vector.shape_cast %4 : vector<16x128xf32> to vector<1x16x128xf32>
    %6 = vector.broadcast %5 : vector<1x16x128xf32> to vector<2x16x128xf32>
    %7 = arith.addf %3, %6 : vector<2x16x128xf32>
    %c0_5 = arith.constant 0 : index
    %c0_6 = arith.constant 0 : index
    %8 = vector.load %arg4[%c0_5, %c0_6] : memref<1x128xf32, #tpu.memory_space<vmem>>, vector<1x128xf32>
    %9 = vector.shape_cast %8 : vector<1x128xf32> to vector<1x1x128xf32>
    %10 = vector.shape_cast %9 : vector<1x1x128xf32> to vector<1x1x128xf32>
    %11 = vector.broadcast %10 : vector<1x1x128xf32> to vector<2x1x128xf32>
    %c0_7 = arith.constant 0 : index
    %c0_8 = arith.constant 0 : index
    %c0_9 = arith.constant 0 : index
    %12 = vector.load %arg5[%c0_7, %c0_8, %c0_9] : memref<2x17x128xf32, #tpu.memory_space<vmem>>, vector<2x1x128xf32>
    tpu.vector_store %arg5[%c0_7, %c0_8, %c0_9], %11 {strides = array<i32>} : memref<2x17x128xf32, #tpu.memory_space<vmem>>, vector<2x1x128xf32>,
    %c0_10 = arith.constant 0 : index
    %c1 = arith.constant 1 : index
    %c0_11 = arith.constant 0 : index
    %13 = vector.load %arg5[%c0_10, %c1, %c0_11] : memref<2x17x128xf32, #tpu.memory_space<vmem>>, vector<2x16x128xf32>
    tpu.vector_store %arg5[%c0_10, %c1, %c0_11], %7 {strides = array<i32>} : memref<2x17x128xf32, #tpu.memory_space<vmem>>, vector<2x16x128xf32>,
    return
  }
  func.func @transform_0(%arg0: i32) -> (i32, i32) {
    %c0_i32 = arith.constant 0 : i32
    %c0_i32_0 = arith.constant 0 : i32
    return %arg0, %c0_i32 : i32, i32
  }
  func.func @transform_1(%arg0: i32) -> (i32, i32) {
    %c0_i32 = arith.constant 0 : i32
    %c0_i32_0 = arith.constant 0 : i32
    %c0_i32_1 = arith.constant 0 : i32
    return %c0_i32, %c0_i32_0 : i32, i32
  }
  func.func @transform_2(%arg0: i32) -> (i32, i32) {
    %c0_i32 = arith.constant 0 : i32
    %c0_i32_0 = arith.constant 0 : i32
    %c0_i32_1 = arith.constant 0 : i32
    return %c0_i32, %c0_i32_0 : i32, i32
  }
  func.func @transform_3(%arg0: i32) -> (i32, i32) {
    %c0_i32 = arith.constant 0 : i32
    %c0_i32_0 = arith.constant 0 : i32
    %c0_i32_1 = arith.constant 0 : i32
    return %c0_i32, %c0_i32_0 : i32, i32
  }
  func.func @transform_4(%arg0: i32) -> (i32, i32, i32) {
    %c0_i32 = arith.constant 0 : i32
    %c0_i32_0 = arith.constant 0 : i32
    %c0_i32_1 = arith.constant 0 : i32
    return %arg0, %c0_i32, %c0_i32_0 : i32, i32, i32
  }
}

</mosaic_0001>

<bundles_post_ra>
// kernel: tpu_custom_call.1
= control target key start
LH: loop header
LB: loop body
LE: loop exit
PB: predicated region body
PF: predicated region fallthrough
CT: control target
= control target key end

     0   :  { %9 = vsyncpa [#allocation3], 0  ;;  %s466_s0 = inlined_call_operand.hbm [shape: f32[32,256], index: 0, kind: input, shape index: {}]   ;;  %s467_s1 = inlined_call_operand.hbm [shape: f32[256,128], index: 1, kind: input, shape index: {}]   ;;  %s468_s2 = inlined_call_operand.hbm [shape: f32[16,128], index: 2, kind: input, shape index: {}]   ;;  %s469_s3 = inlined_call_operand.vmem [shape: f32[1,128], index: 3, kind: input, shape index: {}]   ;;  %s470_s4 = inlined_call_operand.vmem [shape: f32[2,17,128], index: 4, kind: output, shape index: {}]  }
   0x1   :  { %10 = vsyncpa [#allocation5], 0  ;;  %s371_s15 = smov [#allocation4]   ;;  %s301_s19 = scalar_lea.hbm %s467_s1, 4096 }
   0x2   :  { %s28_s16 = sshll.u32 %s371_s15, 4  ;;  %p302_p0 = scmp.ne.s32.totalorder %s467_s1, %s301_s19  ;;  %s29_s16 = int_to_ptr.vmem [resolvable:$true] %s28_s16 }
   0x3   :  { %p305_p1 = scmp.lt.u32.totalorder %s301_s19, %s467_s1 }
   0x5   :  { %p307_p2 = pnand %p305_p1, %p302_p0 }
   0x7   :  { %310 = shalt.err (!%p307_p2)
}
   0x8   :  { %s311_s24 = scalar_lea.vmem %s29_s16, 4096  ;;  %p316_p4 = scmp.lt.s32.totalorder %s29_s16, %s29_s16 }
   0x9   :  { %p312_p3 = scmp.ne.s32.totalorder %s29_s16, %s311_s24  ;;  %p317_p5 = scmp.lt.s32.totalorder %s311_s24, %s311_s24 }
   0xb   :  { %p318_p6 = por %p317_p5, %p316_p4 }
   0xd   :  { %p319_p7 = pnand %p318_p6, %p312_p3 }
   0xf   :  { %322 = shalt.err (!%p319_p7)
}
  0x10   :  { %s372_s25 = smov 128   ;;  %s373_s26 = smov 8  }
  0x11   :  { %34 = dma.hbm_to_vmem [thread:$0]  %s467_s1, 4096, %s29_s16, [#allocation5], %s372_s25, %s372_s25, %s373_s26  }
  0x12   :  { %s374_s29 = smov [#allocation2]   ;;  %s323_s7 = scalar_lea.hbm %s466_s0, 1024 }
  0x13   :  { %s16_s30 = sshll.u32 %s374_s29, 4  ;;  %p324_p8 = scmp.ne.s32.totalorder %s466_s0, %s323_s7  ;;  %s17_s30 = int_to_ptr.vmem [resolvable:$true] %s16_s30 }
  0x14   :  { %p327_p9 = scmp.lt.u32.totalorder %s323_s7, %s466_s0 }
  0x16   :  { %p329_p10 = pnand %p327_p9, %p324_p8 }
  0x18   :  { %332 = shalt.err (!%p329_p10)
}
  0x19   :  { %s333_s12 = scalar_lea.vmem %s17_s30, 1024  ;;  %p338_p12 = scmp.lt.s32.totalorder %s17_s30, %s17_s30 }
  0x1a   :  { %p334_p11 = scmp.ne.s32.totalorder %s17_s30, %s333_s12  ;;  %p339_p13 = scmp.lt.s32.totalorder %s333_s12, %s333_s12 }
  0x1c   :  { %p340_p0 = por %p339_p13, %p338_p12 }
  0x1e   :  { %p341_p1 = pnand %p340_p0, %p334_p11 }
  0x20   :  { %344 = shalt.err (!%p341_p1)
}
  0x21   :  { %s375_s1 = smov 256   ;;  %s376_s13 = smov 16  }
  0x22   :  { %22 = dma.hbm_to_vmem [thread:$0]  %s466_s0, 1024, %s17_s30, [#allocation3], %s375_s1, %s375_s1, %s376_s13  }
  0x23   :  { %s377_s16 = smov [#allocation6]   ;;  %s345_s20 = scalar_lea.hbm %s468_s2, 256 }
  0x24   :  { %s40_s17 = sshll.u32 %s377_s16, 4  ;;  %p346_p2 = scmp.ne.s32.totalorder %s468_s2, %s345_s20  ;;  %s41_s17 = int_to_ptr.vmem [resolvable:$true] %s40_s17 }
  0x25   :  { %p349_p3 = scmp.lt.u32.totalorder %s345_s20, %s468_s2 }
  0x27   :  { %p351_p4 = pnand %p349_p3, %p346_p2 }
  0x29   :  { %354 = shalt.err (!%p351_p4)
}
  0x2a   :  { %s355_s27 = scalar_lea.vmem %s41_s17, 256  ;;  %p360_p6 = scmp.lt.s32.totalorder %s41_s17, %s41_s17 }
  0x2b   :  { %p356_p5 = scmp.ne.s32.totalorder %s41_s17, %s355_s27  ;;  %p361_p7 = scmp.lt.s32.totalorder %s355_s27, %s355_s27 }
  0x2d   :  { %p362_p8 = por %p361_p7, %p360_p6 }
  0x2f   :  { %p363_p9 = pnand %p362_p8, %p356_p5 }
  0x31   :  { %366 = shalt.err (!%p363_p9)
}
  0x32   :  { %46 = dma.hbm_to_vmem [thread:$0]  %s468_s2, 256, %s41_s17, [#allocation5], %s372_s25, %s372_s25, %s373_s26  }
  0x33   :  { %367 = dma.done.wait [#allocation3], 1024  }
  0x34   :  { %368 = vsyncadd [#allocation3], 4294966272 }
  0x35   :  { %369 = dma.done.wait [#allocation5], 4352  }
  0x36   :  { %370 = vsyncadd [#allocation5], 4294962944  ;;  %v189_v0 = vld [vmem:[%s469_s3] sm:$0x1]  ;;  %v82_v1 = vld [vmem:[#allocation4 + $0x80] sm:$0xff] }
  0x37   :  { %v83_v2 = vld [vmem:[#allocation4 + $0x88] sm:$0xff]  ;;  %190 = vst [vmem:[%s470_s4] sm:$0x1] %v189_v0  ;;  %191 = vst [vmem:[%s470_s4 + $0x18] sm:$0x1] %v189_v0  ;;  %v66_v4 = vld [vmem:[#allocation4] sm:$0xff] }
  0x38   :  { %v246_v3 = vpack.c.bf16 %v83_v2, %v82_v1  ;;  %v67_v5 = vld [vmem:[#allocation4 + $0x8] sm:$0xff]  ;;  %v84_v6 = vld [vmem:[#allocation4 + $0x90] sm:$0xff]  ;;  %v85_v8 = vld [vmem:[#allocation4 + $0x98] sm:$0xff] }
  0x39   :  { %v248_v7 = vpack.c.bf16 %v67_v5, %v66_v4  ;;  %v68_v9 = vld [vmem:[#allocation4 + $0x10] sm:$0xff]  ;;  %v69_v10 = vld [vmem:[#allocation4 + $0x18] sm:$0xff]  ;;  %v250_v11 = vpack.c.bf16 %v85_v8, %v84_v6  ;;  %v86_v12 = vld [vmem:[#allocation4 + $0xa0] sm:$0xff] }
  0x3a   :  { %247 = vmatprep.subr.bf16.mxu0 %v246_v3  ;;  %278 = vmatprep.subr.bf16.mxu1 %v246_v3  ;;  %v87_v13 = vld [vmem:[#allocation4 + $0xa8] sm:$0xff]  ;;  %v252_v14 = vpack.c.bf16 %v69_v10, %v68_v9  ;;  %v70_v16 = vld [vmem:[#allocation4 + $0x20] sm:$0xff]  ;;  %v88_v18 = vld [vmem:[#allocation4 + $0xb0] sm:$0xff] }
  0x3b   :  { %249 = vmatpush3.bf16.msra.mxu0 %v248_v7  ;;  %286 = vmatpush3.bf16.msra.mxu1 %v248_v7  ;;  %v254_v15 = vpack.c.bf16 %v87_v13, %v86_v12  ;;  %v71_v17 = vld [vmem:[#allocation4 + $0x28] sm:$0xff]  ;;  %v89_v19 = vld [vmem:[#allocation4 + $0xb8] sm:$0xff]  ;;  %v72_v22 = vld [vmem:[#allocation4 + $0x30] sm:$0xff] }
  0x3c   :  { %251 = vmatprep.subr.bf16.mxu0 %v250_v11  ;;  %279 = vmatprep.subr.bf16.mxu1 %v250_v11  ;;  %v256_v20 = vpack.c.bf16 %v71_v17, %v70_v16  ;;  %v258_v21 = vpack.c.bf16 %v89_v19, %v88_v18  ;;  %v73_v23 = vld [vmem:[#allocation4 + $0x38] sm:$0xff]  ;;  %v90_v24 = vld [vmem:[#allocation4 + $0xc0] sm:$0xff]  ;;  %v91_v25 = vld [vmem:[#allocation4 + $0xc8] sm:$0xff] }
  0x3d   :  { %v59_v26 = vld [vmem:[#allocation2 + $0x8] sm:$0xff]  ;;  %v260_v28 = vpack.c.bf16 %v73_v23, %v72_v22  ;;  %v262_v29 = vpack.c.bf16 %v91_v25, %v90_v24  ;;  %v74_v30 = vld [vmem:[#allocation4 + $0x40] sm:$0xff]  ;;  %v92_v32 = vld [vmem:[#allocation4 + $0xd0] sm:$0xff] }
  0x3e   :  { %v63_v27 = vld [vmem:[#allocation2 + $0x28] sm:$0xff]  ;;  %v93_v33 = vld [vmem:[#allocation4 + $0xd8] sm:$0xff]  ;;  %162 = vmatprep.mubr.f32.mxu0 %v59_v26  ;;  %v76_v36 = vld [vmem:[#allocation4 + $0x50] sm:$0xff] }
  0x3f   :  { %253 = vmatpush3.bf16.msra.mxu0 %v252_v14  ;;  %287 = vmatpush3.bf16.msra.mxu1 %v252_v14  ;;  %v75_v31 = vld [vmem:[#allocation4 + $0x48] sm:$0xff]  ;;  %v266_v35 = vpack.c.bf16 %v93_v33, %v92_v32  ;;  %v77_v37 = vld [vmem:[#allocation4 + $0x58] sm:$0xff]  ;;  %v94_v38 = vld [vmem:[#allocation4 + $0xe0] sm:$0xff] }
  0x40   :  { %255 = vmatprep.subr.bf16.mxu0 %v254_v15  ;;  %280 = vmatprep.subr.bf16.mxu1 %v254_v15  ;;  %v264_v34 = vpack.c.bf16 %v75_v31, %v74_v30  ;;  %v95_v39 = vld [vmem:[#allocation4 + $0xe8] sm:$0xff]  ;;  %v268_v40 = vpack.c.bf16 %v77_v37, %v76_v36  ;;  %v78_v42 = vld [vmem:[#allocation4 + $0x60] sm:$0xff]  ;;  %v96_v44 = vld [vmem:[#allocation4 + $0xf0] sm:$0xff] }
  0x41   :  { %172 = vmatprep.mubr.f32.mxu1 %v63_v27  ;;  %v270_v41 = vpack.c.bf16 %v95_v39, %v94_v38  ;;  %v79_v43 = vld [vmem:[#allocation4 + $0x68] sm:$0xff]  ;;  %v97_v45 = vld [vmem:[#allocation4 + $0xf8] sm:$0xff]  ;;  %v80_v48 = vld [vmem:[#allocation4 + $0x70] sm:$0xff] }
  0x42   :  { %v272_v46 = vpack.c.bf16 %v79_v43, %v78_v42  ;;  %v274_v47 = vpack.c.bf16 %v97_v45, %v96_v44  ;;  %v81_v49 = vld [vmem:[#allocation4 + $0x78] sm:$0xff]  ;;  %v58_v51 = vld [vmem:[#allocation2] sm:$0xff]  ;;  %v60_v55 = vld [vmem:[#allocation2 + $0x10] sm:$0xff] }
  0x43   :  { %257 = vmatpush3.bf16.msra.mxu0 %v256_v20  ;;  %288 = vmatpush3.bf16.msra.mxu1 %v256_v20  ;;  %v276_v50 = vpack.c.bf16 %v81_v49, %v80_v48  ;;  %v62_v52 = vld [vmem:[#allocation2 + $0x20] sm:$0xff]  ;;  %v61_v53 = vld [vmem:[#allocation2 + $0x18] sm:$0xff]  ;;  %v64_v56 = vld [vmem:[#allocation2 + $0x30] sm:$0xff] }
  0x44   :  { %259 = vmatprep.subr.bf16.mxu0 %v258_v21  ;;  %281 = vmatprep.subr.bf16.mxu1 %v258_v21  ;;  %v65_v54 = vld [vmem:[#allocation2 + $0x38] sm:$0xff]  ;;  %v183_v60 = vld [vmem:[#allocation6] sm:$0xff]  ;;  %v184_v5 = vld [vmem:[#allocation6 + $0x8] sm:$0xff] }
  0x47   :  { %261 = vmatpush3.bf16.msra.mxu0 %v260_v28  ;;  %289 = vmatpush3.bf16.msra.mxu1 %v260_v28 }
  0x48   :  { %263 = vmatprep.subr.bf16.mxu0 %v262_v29  ;;  %282 = vmatprep.subr.bf16.mxu1 %v262_v29 }
  0x4b   :  { %265 = vmatpush3.bf16.msra.mxu0 %v264_v34  ;;  %290 = vmatpush3.bf16.msra.mxu1 %v264_v34 }
  0x4c   :  { %267 = vmatprep.subr.bf16.mxu0 %v266_v35  ;;  %283 = vmatprep.subr.bf16.mxu1 %v266_v35 }
  0x4f   :  { %269 = vmatpush3.bf16.msra.mxu0 %v268_v40  ;;  %291 = vmatpush3.bf16.msra.mxu1 %v268_v40 }
  0x50   :  { %271 = vmatprep.subr.bf16.mxu0 %v270_v41  ;;  %284 = vmatprep.subr.bf16.mxu1 %v270_v41 }
  0x53   :  { %273 = vmatpush3.bf16.msra.mxu0 %v272_v46  ;;  %292 = vmatpush3.bf16.msra.mxu1 %v272_v46 }
  0x54   :  { %275 = vmatprep.subr.bf16.mxu0 %v274_v47  ;;  %285 = vmatprep.subr.bf16.mxu1 %v274_v47 }
  0x57   :  { %277 = vmatpush3.bf16.msra.mxu0 %v276_v50  ;;  %293 = vmatpush3.bf16.msra.mxu1 %v276_v50 }
  0x5a   :  { %163 = vmatmul.mubr.f32.vlgmr.msra.gmra.mrb[0].mxu0 %v58_v51  ;;  %173 = vmatmul.mubr.f32.vlgmr.msra.gmra.mrb[0].mxu1 %v62_v52 }
  0x5b   :  { %167 = vmatprep.mubr.f32.mxu0 %v61_v53  ;;  %177 = vmatprep.mubr.f32.mxu1 %v65_v54 }
  0x5e   :  { %168 = vmatmul.mubr.f32.gmra.mrb[2].mxu0 %v60_v55  ;;  %178 = vmatmul.mubr.f32.gmra.mrb[2].mxu1 %v64_v56 }
 0x12d   :  { %v234_v57 = vpop.f32.mrb[0].mxu0  ;;  %v240_v58 = vpop.f32.mrb[0].mxu1 }
 0x12e   :  { %v235_v59 = vpop.f32.mrb[1].mxu0  ;;  %v241_v61 = vpop.f32.mrb[1].mxu1 }
 0x12f   :  { %v236_v62 = vadd.f32 %v235_v59, %v234_v57  ;;  %v242_v63 = vadd.f32 %v241_v61, %v240_v58 }
 0x131   :  { %v185_v0 = vadd.f32 %v236_v62, %v183_v60  ;;  %v187_v1 = vadd.f32 %v242_v63, %v183_v60  ;;  %v237_v2 = vpop.f32.mrb[2].mxu0  ;;  %v243_v3 = vpop.f32.mrb[2].mxu1 }
 0x132   :  { %v238_v4 = vpop.f32.mrb[3].mxu0  ;;  %v244_v6 = vpop.f32.mrb[3].mxu1 }
 0x133   :  { %192 = vst [vmem:[%s470_s4 + $0x1] sm:$0xff] %v185_v0  ;;  %194 = vst [vmem:[%s470_s4 + $0x19] sm:$0xff] %v187_v1  ;;  %v239_v7 = vadd.f32 %v238_v4, %v237_v2  ;;  %v245_v8 = vadd.f32 %v244_v6, %v243_v3 }
 0x135   :  { %v186_v9 = vadd.f32 %v239_v7, %v184_v5  ;;  %v188_v10 = vadd.f32 %v245_v8, %v184_v5 }
 0x137   :  { %193 = vst [vmem:[%s470_s4 + $0x9] sm:$0xff] %v186_v9  ;;  %195 = vst [vmem:[%s470_s4 + $0x21] sm:$0xff] %v188_v10 }
 0x138   :  { %200 = vsyncpa [#allocation3], 1 }
 0x139   :  { %201 = vsyncpa [#allocation5], 1 }

</bundles_post_ra>
